<compile_context>
chip_gen: v6e
topology: v6e:2x2x1
jax: 0.10.0
libtpu: 0.0.40
codegen_flags: <defaults>
</compile_context>

<pallas_src>
import functools

import jax
import jax.numpy as jnp
from jax import lax
from jax.experimental import pallas as pl
from jax.experimental.pallas import tpu as pltpu


# ----------------------------------------------------------------------------
# Kernel 1: shared per-point MLP (Conv1d k=1 stack) + running max over points.
# Output block (Bt, 1024) is the running-max accumulator holding the *raw*
# layer-3 pre-activations (bias/ReLU applied later by the head kernel).
# ----------------------------------------------------------------------------
def _pointloop_kernel(x_ref, w1_ref, b1_ref, w2_ref, b2_ref, w3_ref, o_ref,
                      *, n_valid, hid_tile, need_mask):
    n = pl.program_id(1)
    bt, in_dim, nt = x_ref.shape
    hid = o_ref.shape[-1]
    wdt = w1_ref.dtype                  # matmul compute dtype (f32 or bf16)

    @pl.when(n == 0)
    def _():
        o_ref[...] = jnp.full(o_ref.shape, -jnp.inf, o_ref.dtype)

    # NCW tile -> (Bt*Nt, in_dim) rows with channels on the lane axis, so each
    # Conv1d(k=1) is a row-major (rows, Cin) @ (Cin, Cout) MXU matmul.
    x = x_ref[...]
    xt = jnp.transpose(x, (0, 2, 1)).reshape(bt * nt, in_dim)

    # TODO(synk): if profiling shows MXU passes are the binding slot (v6e/v7x),
    # layer 1 (K=in_dim=3) could instead be done as VPU broadcast mul-adds.
    h = jnp.maximum(
        jnp.dot(xt.astype(wdt), w1_ref[...],
                preferred_element_type=jnp.float32) + b1_ref[...], 0.0)
    h = jnp.maximum(
        jnp.dot(h.astype(wdt), w2_ref[...],
                preferred_element_type=jnp.float32) + b2_ref[...], 0.0)
    h = h.astype(wdt)                   # (rows, 128) layer-3 input

    if need_mask:
        # Mask the padded points of the last partial tile with -inf so they
        # never win the running max (bias/ReLU are applied after the max).
        pid = n * nt + lax.broadcasted_iota(jnp.int32, (1, nt), 1)
        valid = (pid < n_valid)[:, :, None]          # (1, Nt, 1) bool

    # Layer 3 in hid_tile-wide column slices of w3; each slice is reduced
    # straight into the matching accumulator columns, so the full
    # (rows, 1024) activation is never materialized.
    for s in range(hid // hid_tile):
        lo = s * hid_tile
        z = jnp.dot(h, w3_ref[:, lo:lo + hid_tile],
                    preferred_element_type=jnp.float32)        # (rows, hs) f32
        zr = z.reshape(bt, nt, hid_tile)
        if need_mask:
            zr = jnp.where(valid, zr, -jnp.inf)
        o_ref[:, lo:lo + hid_tile] = jnp.maximum(
            o_ref[:, lo:lo + hid_tile], zr.max(axis=1))


# ----------------------------------------------------------------------------
# Kernel 2: hoisted layer-3 epilogue + Linear head + identity add.
# ----------------------------------------------------------------------------
def _head_kernel(pool_ref, b3_ref, w4_ref, b4_ref, w5_ref, b5_ref,
                 w6_ref, b6_ref, ident_ref, o_ref):
    wdt = w4_ref.dtype
    # max_p relu(z_p + b3) == relu(max_p z_p + b3): apply bias/ReLU once here.
    feat = jnp.maximum(pool_ref[...] + b3_ref[...], 0.0)          # (Bt, 1024)
    f = jnp.maximum(
        jnp.dot(feat.astype(wdt), w4_ref[...],
                preferred_element_type=jnp.float32) + b4_ref[...], 0.0)
    f = jnp.maximum(
        jnp.dot(f.astype(wdt), w5_ref[...],
                preferred_element_type=jnp.float32) + b5_ref[...], 0.0)
    out = jnp.dot(f.astype(wdt), w6_ref[...],
                  preferred_element_type=jnp.float32) + b6_ref[...]
    # (Bt, k*k) store is lane-sparse but written once per batch tile -> noise.
    o_ref[...] = (out + ident_ref[...]).astype(o_ref.dtype)


# ----------------------------------------------------------------------------
# Tiling helpers.
# ----------------------------------------------------------------------------
def _pick_batch_tile(batch):
    # Blocks must be 8-aligned or the full dim; prefer Bt=8 so B>=16 gives
    # >=2 batch tiles for megacore sharding on v7x.
    return batch if batch <= 8 else 8


def _pick_point_tile(num_points, bt, max_rows):
    # Multiple of 128 (lane tiling); cdiv-grid + in-kernel masking handles the
    # remainder, so nt does NOT need to divide N.
    cap = max(128, max_rows // max(bt, 1))
    if num_points <= cap:
        return num_points
    return max(128, (cap // 128) * 128)


def tnet_forward(x_bcn, params, k, *, max_rows=4096):
    """x_bcn: (B, in_dim, N) float32, PyTorch NCW layout. Returns (B, k*k) f32."""
    B, in_dim, N = x_bcn.shape
    kk = k * k
    (w1, b1, w2, b2, w3, b3, w4, b4, w5, b5, w6, b6) = params
    hid = w3.shape[1]                    # 1024

    bt = _pick_batch_tile(B)
    nt = _pick_point_tile(N, bt, max_rows)
    grid = (pl.cdiv(B, bt), pl.cdiv(N, nt))
    hid_tile = 256 if hid % 256 == 0 else hid
    need_mask = (N % nt) != 0

    def inv(a):                          # grid-invariant weight/bias block
        return pl.BlockSpec(a.shape, lambda b, n: (0, 0))
    # NOTE: pipeline_mode=pl.Buffered(1) would single-buffer these invariant
    # blocks; with the head split into its own call they total <0.5 MB, so the
    # default double buffer is kept for lowering portability.

    kernel1 = functools.partial(_pointloop_kernel, n_valid=N,
                                hid_tile=hid_tile, need_mask=need_mask)

    flops = 2 * B * N * (in_dim * w1.shape[1]
                         + w2.shape[0] * w2.shape[1]
                         + w3.shape[0] * w3.shape[1])
    bytes_accessed = (x_bcn.size * x_bcn.dtype.itemsize
                      + sum(int(p.size) * p.dtype.itemsize
                            for p in (w1, b1, w2, b2, w3))
                      + B * hid * 4)

    pooled = pl.pallas_call(
        kernel1,
        out_shape=jax.ShapeDtypeStruct((B, hid), jnp.float32),
        grid_spec=pltpu.PrefetchScalarGridSpec(
            num_scalar_prefetch=0,
            grid=grid,
            in_specs=[
                pl.BlockSpec((bt, in_dim, nt), lambda b, n: (b, 0, n)),
                inv(w1), inv(b1), inv(w2), inv(b2), inv(w3),
            ],
            out_specs=pl.BlockSpec((bt, hid), lambda b, n: (b, 0)),
        ),
        compiler_params=pltpu.CompilerParams(
            dimension_semantics=("parallel", "arbitrary"),
            vmem_limit_bytes=48 * 1024 * 1024),
        cost_estimate=pl.CostEstimate(flops=int(flops), transcendentals=0,
                                      bytes_accessed=int(bytes_accessed)),
    )(x_bcn, w1, b1, w2, b2, w3)

    # ---- tiny head over the pooled (B, 1024) features -----------------------
    ident = jnp.eye(k, dtype=jnp.float32).reshape(1, kk)
    bt_h = B if B <= 128 else 128

    def inv1(a):
        return pl.BlockSpec(a.shape, lambda i: (0, 0))

    return pl.pallas_call(
        _head_kernel,
        out_shape=jax.ShapeDtypeStruct((B, kk), jnp.float32),
        grid_spec=pltpu.PrefetchScalarGridSpec(
            num_scalar_prefetch=0,
            grid=(pl.cdiv(B, bt_h),),
            in_specs=[
                pl.BlockSpec((bt_h, hid), lambda i: (i, 0)),
                inv1(b3), inv1(w4), inv1(b4), inv1(w5), inv1(b5),
                inv1(w6), inv1(b6), inv1(ident),
            ],
            out_specs=pl.BlockSpec((bt_h, kk), lambda i: (i, 0)),
        ),
        compiler_params=pltpu.CompilerParams(
            dimension_semantics=("parallel",),
            vmem_limit_bytes=32 * 1024 * 1024),
    )(pooled, b3, w4, b4, w5, b5, w6, b6, ident)


# ----------------------------------------------------------------------------
# Parameters / reference.
# ----------------------------------------------------------------------------
def init_params(key, in_dim, k, dtype=jnp.float32):
    """Deterministic synthetic parameters (shapes match nn.Conv1d / nn.Linear).
    Weights stored as (Cin, Cout): kernel computes x @ W (== PyTorch x @ W.T)."""
    dims = [(in_dim, 64), (64, 128), (128, 1024),
            (1024, 512), (512, 256), (256, k * k)]
    params = []
    for kk_, (cin, cout) in zip(jax.random.split(key, len(dims)), dims):
        kw, kb = jax.random.split(kk_)
        scale = 1.0 / jnp.sqrt(jnp.float32(cin))
        w = jax.random.uniform(kw, (cin, cout), jnp.float32, -scale, scale)
        b = jax.random.uniform(kb, (1, cout), jnp.float32, -scale, scale)
        params += [w.astype(dtype), b]            # biases stay f32
    return tuple(params)


def cast_weight_dtype(params, dtype):
    """Cast weight matrices (even entries) to `dtype`; keep biases f32."""
    return tuple(p.astype(dtype) if i % 2 == 0 else p
                 for i, p in enumerate(params))


def tnet_reference(x_bcn, params, k):
    """Pure-JAX reference of the PyTorch forward (f32 math)."""
    (w1, b1, w2, b2, w3, b3, w4, b4, w5, b5, w6, b6) = params
    f32 = lambda a: a.astype(jnp.float32)
    x = jnp.transpose(x_bcn, (0, 2, 1)).astype(jnp.float32)      # (B, N, Cin)
    h = jax.nn.relu(x @ f32(w1) + b1)
    h = jax.nn.relu(h @ f32(w2) + b2)
    h = jax.nn.relu(h @ f32(w3) + b3)
    feat = jnp.max(h, axis=1)                                    # (B, 1024)
    f = jax.nn.relu(feat @ f32(w4) + b4[0])
    f = jax.nn.relu(f @ f32(w5) + b5[0])
    out = f @ f32(w6) + b6[0]
    ident = jnp.eye(k, dtype=jnp.float32).reshape(1, k * k)
    return out + ident


if __name__ == "__main__":
    in_dim, k = 3, 3
    key = jax.random.PRNGKey(0)
    kx1, kx2, kx3, kp = jax.random.split(key, 4)
    params_f32 = init_params(kp, in_dim, k)       # f32 path -> tight check

    # Case 1: tiny, single grid step (Bt=B, Nt=N).
    x1 = jax.random.normal(kx1, (2, in_dim, 16), jnp.float32)
    out1 = jax.block_until_ready(tnet_forward(x1, params_f32, k))
    ref1 = tnet_reference(x1, params_f32, k)
    assert out1.shape == (2, k * k)
    assert jnp.allclose(out1, ref1, atol=1e-3, rtol=1e-3), "case1 mismatch"

    # Case 2: tiled point axis (grid=(1,2), Nt=128) + hid-sliced layer 3.
    x2 = jax.random.normal(kx2, (4, in_dim, 256), jnp.float32)
    out2 = jax.block_until_ready(tnet_forward(x2, params_f32, k, max_rows=512))
    ref2 = tnet_reference(x2, params_f32, k)
    assert out2.shape == (4, k * k)
    assert jnp.allclose(out2, ref2, atol=1e-3, rtol=1e-3), "case2 mismatch"

    # Case 3: ragged N (masked partial point tile) + bf16 matmul operands.
    params_bf16 = cast_weight_dtype(params_f32, jnp.bfloat16)
    x3 = jax.random.normal(kx3, (3, in_dim, 200), jnp.float32)
    out3 = jax.block_until_ready(tnet_forward(x3, params_bf16, k, max_rows=384))
    ref3 = tnet_reference(x3, params_bf16, k)     # same bf16 weights, f32 math
    assert out3.shape == (3, k * k)
    assert jnp.allclose(out3, ref3, atol=5e-2, rtol=5e-2), "case3 mismatch"

    print("KERNEL_OK")
</pallas_src>

<mosaic_0001>
module attributes {stable_mosaic.version = 11 : i64} {
  func.func @_pointloop_kernel(%arg0: i32, %arg1: i32, %arg2: memref<2x3x16xf32, #tpu.memory_space<vmem>>, %arg3: memref<3x64xf32, #tpu.memory_space<vmem>>, %arg4: memref<1x64xf32, #tpu.memory_space<vmem>>, %arg5: memref<64x128xf32, #tpu.memory_space<vmem>>, %arg6: memref<1x128xf32, #tpu.memory_space<vmem>>, %arg7: memref<128x1024xf32, #tpu.memory_space<vmem>>, %arg8: memref<2x1024xf32, #tpu.memory_space<vmem>>) attributes {dimension_semantics = [#tpu.dimension_semantics<parallel>, #tpu.dimension_semantics<arbitrary>], iteration_bounds = array<i64: 1, 1>, scalar_prefetch = 0 : i64, scratch_operands = 0 : i64, tpu.core_type = #tpu.core_type<tc>, window_params = [{transform_indices = @transform_0, window_bounds = array<i64: 2, 3, 16>}, {pipeline_mode = #tpu.pipeline_mode<synchronous>, transform_indices = @transform_1, window_bounds = array<i64: 3, 64>}, {pipeline_mode = #tpu.pipeline_mode<synchronous>, transform_indices = @transform_2, window_bounds = array<i64: 1, 64>}, {pipeline_mode = #tpu.pipeline_mode<synchronous>, transform_indices = @transform_3, window_bounds = array<i64: 64, 128>}, {pipeline_mode = #tpu.pipeline_mode<synchronous>, transform_indices = @transform_4, window_bounds = array<i64: 1, 128>}, {pipeline_mode = #tpu.pipeline_mode<synchronous>, transform_indices = @transform_5, window_bounds = array<i64: 128, 1024>}, {transform_indices = @transform_6, window_bounds = array<i64: 2, 1024>}]} {
    %c0_i32 = arith.constant 0 : i32
    %0 = arith.cmpi eq, %arg1, %c0_i32 : i32
    %1 = arith.extui %0 : i1 to i32
    %c0_i32_0 = arith.constant 0 : i32
    %2 = arith.cmpi ne, %1, %c0_i32_0 : i32
    scf.if %2 {
      %cst_43 = arith.constant 0xFF800000 : f32
      %48 = vector.broadcast %cst_43 : f32 to vector<2x1024xf32>
      %c0_44 = arith.constant 0 : index
      %c0_45 = arith.constant 0 : index
      %49 = vector.load %arg8[%c0_44, %c0_45] : memref<2x1024xf32, #tpu.memory_space<vmem>>, vector<2x1024xf32>
      tpu.vector_store %arg8[%c0_44, %c0_45], %48 {strides = array<i32>} : memref<2x1024xf32, #tpu.memory_space<vmem>>, vector<2x1024xf32>,
    } else {
    }
    %c0 = arith.constant 0 : index
    %c0_1 = arith.constant 0 : index
    %c0_2 = arith.constant 0 : index
    %3 = vector.load %arg2[%c0, %c0_1, %c0_2] : memref<2x3x16xf32, #tpu.memory_space<vmem>>, vector<2x3x16xf32>
    %4 = tpu.transpose %3, [0, 2, 1] : vector<2x3x16xf32> -> vector<2x16x3xf32>
    %5 = vector.shape_cast %4 : vector<2x16x3xf32> to vector<32x3xf32>
    %c0_3 = arith.constant 0 : index
    %c0_4 = arith.constant 0 : index
    %6 = vector.load %arg3[%c0_3, %c0_4] : memref<3x64xf32, #tpu.memory_space<vmem>>, vector<3x64xf32>
    %cst = arith.constant dense<0.000000e+00> : vector<32x64xf32>
    %7 = tpu.matmul %5, %6, %cst {dimension_numbers = #tpu.dot_dimension_numbers<[1], [0], [0], [1], [0, 0, 1, 1], [], []>} : vector<32x3xf32>, vector<3x64xf32>, vector<32x64xf32> -> vector<32x64xf32>
    %c0_5 = arith.constant 0 : index
    %c0_6 = arith.constant 0 : index
    %8 = vector.load %arg4[%c0_5, %c0_6] : memref<1x64xf32, #tpu.memory_space<vmem>>, vector<1x64xf32>
    %9 = vector.broadcast %8 : vector<1x64xf32> to vector<32x64xf32>
    %10 = arith.addf %7, %9 : vector<32x64xf32>
    %cst_7 = arith.constant 0.000000e+00 : f32
    %11 = vector.broadcast %cst_7 : f32 to vector<32x64xf32>
    %12 = arith.maximumf %10, %11 : vector<32x64xf32>
    %c0_8 = arith.constant 0 : index
    %c0_9 = arith.constant 0 : index
    %13 = vector.load %arg5[%c0_8, %c0_9] : memref<64x128xf32, #tpu.memory_space<vmem>>, vector<64x128xf32>
    %cst_10 = arith.constant dense<0.000000e+00> : vector<32x128xf32>
    %14 = tpu.matmul %12, %13, %cst_10 {dimension_numbers = #tpu.dot_dimension_numbers<[1], [0], [0], [1], [0, 0, 1, 1], [], []>} : vector<32x64xf32>, vector<64x128xf32>, vector<32x128xf32> -> vector<32x128xf32>
    %c0_11 = arith.constant 0 : index
    %c0_12 = arith.constant 0 : index
    %15 = vector.load %arg6[%c0_11, %c0_12] : memref<1x128xf32, #tpu.memory_space<vmem>>, vector<1x128xf32>
    %16 = vector.broadcast %15 : vector<1x128xf32> to vector<32x128xf32>
    %17 = arith.addf %14, %16 : vector<32x128xf32>
    %cst_13 = arith.constant 0.000000e+00 : f32
    %18 = vector.broadcast %cst_13 : f32 to vector<32x128xf32>
    %19 = arith.maximumf %17, %18 : vector<32x128xf32>
    %c0_14 = arith.constant 0 : index
    %c0_15 = arith.constant 0 : index
    %20 = vector.load %arg7[%c0_14, %c0_15] : memref<128x1024xf32, #tpu.memory_space<vmem>>, vector<128x256xf32>
    %cst_16 = arith.constant dense<0.000000e+00> : vector<32x256xf32>
    %21 = tpu.matmul %19, %20, %cst_16 {dimension_numbers = #tpu.dot_dimension_numbers<[1], [0], [0], [1], [0, 0, 1, 1], [], []>} : vector<32x128xf32>, vector<128x256xf32>, vector<32x256xf32> -> vector<32x256xf32>
    %22 = vector.shape_cast %21 : vector<32x256xf32> to vector<2x16x256xf32>
    %c0_17 = arith.constant 0 : index
    %c0_18 = arith.constant 0 : index
    %23 = vector.load %arg8[%c0_17, %c0_18] : memref<2x1024xf32, #tpu.memory_space<vmem>>, vector<2x256xf32>
    %cst_19 = arith.constant dense<0xFF800000> : vector<2x256xf32>
    %24 = vector.multi_reduction <maximumf>, %22, %cst_19 [1] : vector<2x16x256xf32> to vector<2x256xf32>
    %25 = arith.maximumf %23, %24 : vector<2x256xf32>
    %c0_20 = arith.constant 0 : index
    %c0_21 = arith.constant 0 : index
    %26 = vector.load %arg8[%c0_20, %c0_21] : memref<2x1024xf32, #tpu.memory_space<vmem>>, vector<2x256xf32>
    tpu.vector_store %arg8[%c0_20, %c0_21], %25 {strides = array<i32>} : memref<2x1024xf32, #tpu.memory_space<vmem>>, vector<2x256xf32>,
    %c0_22 = arith.constant 0 : index
    %c256 = arith.constant 256 : index
    %27 = vector.load %arg7[%c0_22, %c256] : memref<128x1024xf32, #tpu.memory_space<vmem>>, vector<128x256xf32>
    %cst_23 = arith.constant dense<0.000000e+00> : vector<32x256xf32>
    %28 = tpu.matmul %19, %27, %cst_23 {dimension_numbers = #tpu.dot_dimension_numbers<[1], [0], [0], [1], [0, 0, 1, 1], [], []>} : vector<32x128xf32>, vector<128x256xf32>, vector<32x256xf32> -> vector<32x256xf32>
    %29 = vector.shape_cast %28 : vector<32x256xf32> to vector<2x16x256xf32>
    %c0_24 = arith.constant 0 : index
    %c256_25 = arith.constant 256 : index
    %30 = vector.load %arg8[%c0_24, %c256_25] : memref<2x1024xf32, #tpu.memory_space<vmem>>, vector<2x256xf32>
    %cst_26 = arith.constant dense<0xFF800000> : vector<2x256xf32>
    %31 = vector.multi_reduction <maximumf>, %29, %cst_26 [1] : vector<2x16x256xf32> to vector<2x256xf32>
    %32 = arith.maximumf %30, %31 : vector<2x256xf32>
    %c0_27 = arith.constant 0 : index
    %c256_28 = arith.constant 256 : index
    %33 = vector.load %arg8[%c0_27, %c256_28] : memref<2x1024xf32, #tpu.memory_space<vmem>>, vector<2x256xf32>
    tpu.vector_store %arg8[%c0_27, %c256_28], %32 {strides = array<i32>} : memref<2x1024xf32, #tpu.memory_space<vmem>>, vector<2x256xf32>,
    %c0_29 = arith.constant 0 : index
    %c512 = arith.constant 512 : index
    %34 = vector.load %arg7[%c0_29, %c512] : memref<128x1024xf32, #tpu.memory_space<vmem>>, vector<128x256xf32>
    %cst_30 = arith.constant dense<0.000000e+00> : vector<32x256xf32>
    %35 = tpu.matmul %19, %34, %cst_30 {dimension_numbers = #tpu.dot_dimension_numbers<[1], [0], [0], [1], [0, 0, 1, 1], [], []>} : vector<32x128xf32>, vector<128x256xf32>, vector<32x256xf32> -> vector<32x256xf32>
    %36 = vector.shape_cast %35 : vector<32x256xf32> to vector<2x16x256xf32>
    %c0_31 = arith.constant 0 : index
    %c512_32 = arith.constant 512 : index
    %37 = vector.load %arg8[%c0_31, %c512_32] : memref<2x1024xf32, #tpu.memory_space<vmem>>, vector<2x256xf32>
    %cst_33 = arith.constant dense<0xFF800000> : vector<2x256xf32>
    %38 = vector.multi_reduction <maximumf>, %36, %cst_33 [1] : vector<2x16x256xf32> to vector<2x256xf32>
    %39 = arith.maximumf %37, %38 : vector<2x256xf32>
    %c0_34 = arith.constant 0 : index
    %c512_35 = arith.constant 512 : index
    %40 = vector.load %arg8[%c0_34, %c512_35] : memref<2x1024xf32, #tpu.memory_space<vmem>>, vector<2x256xf32>
    tpu.vector_store %arg8[%c0_34, %c512_35], %39 {strides = array<i32>} : memref<2x1024xf32, #tpu.memory_space<vmem>>, vector<2x256xf32>,
    %c0_36 = arith.constant 0 : index
    %c768 = arith.constant 768 : index
    %41 = vector.load %arg7[%c0_36, %c768] : memref<128x1024xf32, #tpu.memory_space<vmem>>, vector<128x256xf32>
    %cst_37 = arith.constant dense<0.000000e+00> : vector<32x256xf32>
    %42 = tpu.matmul %19, %41, %cst_37 {dimension_numbers = #tpu.dot_dimension_numbers<[1], [0], [0], [1], [0, 0, 1, 1], [], []>} : vector<32x128xf32>, vector<128x256xf32>, vector<32x256xf32> -> vector<32x256xf32>
    %43 = vector.shape_cast %42 : vector<32x256xf32> to vector<2x16x256xf32>
    %c0_38 = arith.constant 0 : index
    %c768_39 = arith.constant 768 : index
    %44 = vector.load %arg8[%c0_38, %c768_39] : memref<2x1024xf32, #tpu.memory_space<vmem>>, vector<2x256xf32>
    %cst_40 = arith.constant dense<0xFF800000> : vector<2x256xf32>
    %45 = vector.multi_reduction <maximumf>, %43, %cst_40 [1] : vector<2x16x256xf32> to vector<2x256xf32>
    %46 = arith.maximumf %44, %45 : vector<2x256xf32>
    %c0_41 = arith.constant 0 : index
    %c768_42 = arith.constant 768 : index
    %47 = vector.load %arg8[%c0_41, %c768_42] : memref<2x1024xf32, #tpu.memory_space<vmem>>, vector<2x256xf32>
    tpu.vector_store %arg8[%c0_41, %c768_42], %46 {strides = array<i32>} : memref<2x1024xf32, #tpu.memory_space<vmem>>, vector<2x256xf32>,
    return
  }
  func.func @transform_0(%arg0: i32, %arg1: i32) -> (i32, i32, i32) {
    %c0_i32 = arith.constant 0 : i32
    %c0_i32_0 = arith.constant 0 : i32
    return %arg0, %c0_i32, %arg1 : i32, i32, i32
  }
  func.func @transform_1(%arg0: i32, %arg1: i32) -> (i32, i32) {
    %c0_i32 = arith.constant 0 : i32
    %c0_i32_0 = arith.constant 0 : i32
    %c0_i32_1 = arith.constant 0 : i32
    return %c0_i32, %c0_i32_0 : i32, i32
  }
  func.func @transform_2(%arg0: i32, %arg1: i32) -> (i32, i32) {
    %c0_i32 = arith.constant 0 : i32
    %c0_i32_0 = arith.constant 0 : i32
    %c0_i32_1 = arith.constant 0 : i32
    return %c0_i32, %c0_i32_0 : i32, i32
  }
  func.func @transform_3(%arg0: i32, %arg1: i32) -> (i32, i32) {
    %c0_i32 = arith.constant 0 : i32
    %c0_i32_0 = arith.constant 0 : i32
    %c0_i32_1 = arith.constant 0 : i32
    return %c0_i32, %c0_i32_0 : i32, i32
  }
  func.func @transform_4(%arg0: i32, %arg1: i32) -> (i32, i32) {
    %c0_i32 = arith.constant 0 : i32
    %c0_i32_0 = arith.constant 0 : i32
    %c0_i32_1 = arith.constant 0 : i32
    return %c0_i32, %c0_i32_0 : i32, i32
  }
  func.func @transform_5(%arg0: i32, %arg1: i32) -> (i32, i32) {
    %c0_i32 = arith.constant 0 : i32
    %c0_i32_0 = arith.constant 0 : i32
    %c0_i32_1 = arith.constant 0 : i32
    return %c0_i32, %c0_i32_0 : i32, i32
  }
  func.func @transform_6(%arg0: i32, %arg1: i32) -> (i32, i32) {
    %c0_i32 = arith.constant 0 : i32
    %c0_i32_0 = arith.constant 0 : i32
    return %arg0, %c0_i32 : i32, i32
  }
}

</mosaic_0001>

<bundles_post_ra>
// kernel: tpu_custom_call.1
= control target key start
LH: loop header
LB: loop body
LE: loop exit
PB: predicated region body
PF: predicated region fallthrough
CT: control target
= control target key end

     0   :  { %11 = vsyncpa [#allocation3], 0  ;;  %s1370_s0 = inlined_call_operand.vmem [shape: f32[2,3,16], index: 0, kind: input, shape index: {}]   ;;  %s1371_s1 = inlined_call_operand.vmem [shape: f32[3,64], index: 1, kind: input, shape index: {}]   ;;  %s1372_s2 = inlined_call_operand.vmem [shape: f32[1,64], index: 2, kind: input, shape index: {}]   ;;  %s1373_s3 = inlined_call_operand.hbm [shape: f32[64,128], index: 3, kind: input, shape index: {}]   ;;  %s1374_s4 = inlined_call_operand.vmem [shape: f32[1,128], index: 4, kind: input, shape index: {}]   ;;  %s1375_s5 = inlined_call_operand.hbm [shape: f32[128,1024], index: 5, kind: input, shape index: {}]   ;;  %s1376_s6 = inlined_call_operand.hbm [shape: f32[2,1024], index: 6, kind: output, shape index: {}]  }
   0x1   :  { %12 = vsyncpa [#allocation6], 0 }
   0x2   :  { %13 = vsyncpa [#allocation4], 0  ;;  %s1231_s21 = smov [#allocation2]  }
   0x3   :  { %s25_s22 = sshll.u32 %s1231_s21, 4  ;;  %s26_s22 = int_to_ptr.vmem [resolvable:$true] %s25_s22 }
   0x4   :  { %s1173_s23 = scalar_lea.vmem %s26_s22, 1024  ;;  %p1178_p1 = scmp.lt.s32.totalorder %s26_s22, %s26_s22 }
   0x5   :  { %p1174_p0 = scmp.ne.s32.totalorder %s26_s22, %s1173_s23  ;;  %p1179_p2 = scmp.lt.s32.totalorder %s1173_s23, %s1173_s23 }
   0x7   :  { %p1180_p3 = por %p1179_p2, %p1178_p1 }
   0x9   :  { %p1181_p4 = pnand %p1180_p3, %p1174_p0 }
   0xb   :  { %1184 = shalt.err (!%p1181_p4)
}
   0xc   :  { %s1232_s24 = smov 128   ;;  %s1233_s25 = smov 8  }
   0xd   :  { %31 = dma.hbm_to_vmem [thread:$0]  %s1373_s3, 1024, %s26_s22, [#allocation3], %s1232_s24, %s1232_s24, %s1233_s25  }
   0xe   :  { %s1234_s28 = smov [#allocation5]  }
   0xf   :  { %s39_s29 = sshll.u32 %s1234_s28, 4  ;;  %s40_s29 = int_to_ptr.vmem [resolvable:$true] %s39_s29 }
  0x10   :  { %s1193_s30 = scalar_lea.vmem %s40_s29, 16384  ;;  %p1198_p6 = scmp.lt.s32.totalorder %s40_s29, %s40_s29 }
  0x11   :  { %p1194_p5 = scmp.ne.s32.totalorder %s40_s29, %s1193_s30  ;;  %p1199_p7 = scmp.lt.s32.totalorder %s1193_s30, %s1193_s30 }
  0x13   :  { %p1200_p8 = por %p1199_p7, %p1198_p6 }
  0x15   :  { %p1201_p9 = pnand %p1200_p8, %p1194_p5 }
  0x17   :  { %1204 = shalt.err (!%p1201_p9)
}
  0x18   :  { %s1235_s7 = smov 1024   ;;  %s1236_s8 = smov 64  }
  0x19   :  { %45 = dma.hbm_to_vmem [thread:$0]  %s1375_s5, 16384, %s40_s29, [#allocation6], %s1235_s7, %s1235_s7, %s1236_s8  }
  0x1a   :  { %1225 = dma.done.wait [#allocation3], 1024  }
  0x1b   :  { %1226 = vsyncadd [#allocation3], 4294966272 }
  0x1c   :  { %1227 = dma.done.wait [#allocation6], 16384  }
  0x1d   :  { %1228 = vsyncadd [#allocation6], 4294950912  ;;  %vm145_vm0 = vcmask 1042432   ;;  %v58_v0 = vld [vmem:[%s1370_s0] sm:$0x7]  ;;  %v245_v3 = vld [vmem:[#allocation2 + $0x38] sm:$0xff] }
  0x1e   :  { %v124_v1 = vld [vmem:[%s1371_s1] sm:$0x7]  ;;  %60 = vxpose.xlu0.b32.start.end [1/1] (short) (narrow) %v58_v0, 16  ;;  %v59_v2 = vld [vmem:[%s1370_s0 + $0x4] sm:$0x7]  ;;  %v244_v4 = vld [vmem:[#allocation2 + $0x30] sm:$0xff]  ;;  %1133 = vmatprep.subr.mxu1 %v245_v3 }
  0x1f   :  { %1125 = vmatprep.subr.msk.mxu0 %vm145_vm0, %v124_v1  ;;  %1134 = vmatpush3.msra.mxu1 %v245_v3  ;;  %v243_v5 = vld [vmem:[#allocation2 + $0x28] sm:$0xff]  ;;  %v242_v6 = vld [vmem:[#allocation2 + $0x20] sm:$0xff]  ;;  %vm132_vm1 = vcmask 23552   ;;  %v241_v11 = vld [vmem:[#allocation2 + $0x18] sm:$0xff]  ;;  %vm253_vm2 = vcmask 523264   ;;  %vm530_vm3 = vcmask 1041409  }
  0x20   :  { %1126 = vmatpush3.msk.msra.mxu0 %vm145_vm0, %v124_v1  ;;  %1135 = vmatprep.subr.mxu1 %v244_v4  ;;  %v240_v12 = vld [vmem:[#allocation2 + $0x10] sm:$0xff]  ;;  %v239_v13 = vld [vmem:[#allocation2 + $0x8] sm:$0xff]  ;;  %v238_v14 = vld [vmem:[#allocation2] sm:$0xff]  ;;  %vm532_vm4 = vcmask 1043459   ;;  %vm534_vm5 = vcmask 1045509   ;;  %vm536_vm6 = vcmask 1047559  }
  0x21   :  { %1136 = vmatpush3.msra.mxu1 %v244_v4  ;;  %v386_v15 = vld [vmem:[#allocation5 + $0x3c8] sm:$0xff]  ;;  %v572_v16 = vld [vmem:[#allocation5 + $0x3d8] sm:$0xff]  ;;  %v385_v17 = vld [vmem:[#allocation5 + $0x3c0] sm:$0xff] }
  0x22   :  { %1137 = vmatprep.subr.mxu1 %v243_v5  ;;  %387 = vmatprep.subr.mxu0 %v386_v15  ;;  %v384_v18 = vld [vmem:[#allocation5 + $0x388] sm:$0xff]  ;;  %v383_v19 = vld [vmem:[#allocation5 + $0x380] sm:$0xff]  ;;  %v571_v49 = vld [vmem:[#allocation5 + $0x3d0] sm:$0xff] }
  0x23   :  { %92 = vxpose.xlu0.b32.start.end [1/1] (short) (narrow) %v59_v2, 16  ;;  %1138 = vmatpush3.msra.mxu1 %v243_v5  ;;  %v382_v20 = vld [vmem:[#allocation5 + $0x348] sm:$0xff]  ;;  %v381_v21 = vld [vmem:[#allocation5 + $0x340] sm:$0xff]  ;;  %v570_v50 = vld [vmem:[#allocation5 + $0x398] sm:$0xff] }
  0x24   :  { %1139 = vmatprep.subr.mxu1 %v242_v6  ;;  %v380_v22 = vld [vmem:[#allocation5 + $0x308] sm:$0xff]  ;;  %v379_v23 = vld [vmem:[#allocation5 + $0x300] sm:$0xff]  ;;  %v569_v52 = vld [vmem:[#allocation5 + $0x390] sm:$0xff] }
  0x25   :  { %1140 = vmatpush3.msra.mxu1 %v242_v6  ;;  %v378_v24 = vld [vmem:[#allocation5 + $0x2c8] sm:$0xff]  ;;  %v377_v25 = vld [vmem:[#allocation5 + $0x2c0] sm:$0xff]  ;;  %v568_v54 = vld [vmem:[#allocation5 + $0x358] sm:$0xff] }
  0x26   :  { %1141 = vmatprep.subr.mxu1 %v241_v11  ;;  %v376_v26 = vld [vmem:[#allocation5 + $0x288] sm:$0xff]  ;;  %v375_v27 = vld [vmem:[#allocation5 + $0x280] sm:$0xff]  ;;  %v567_v56 = vld [vmem:[#allocation5 + $0x350] sm:$0xff] }
  0x27   :  { %1142 = vmatpush3.msra.mxu1 %v241_v11  ;;  %v374_v28 = vld [vmem:[#allocation5 + $0x248] sm:$0xff]  ;;  %v373_v29 = vld [vmem:[#allocation5 + $0x240] sm:$0xff]  ;;  %v566_v58 = vld [vmem:[#allocation5 + $0x318] sm:$0xff] }
  0x28   :  { %1143 = vmatprep.subr.mxu1 %v240_v12  ;;  %v372_v30 = vld [vmem:[#allocation5 + $0x208] sm:$0xff]  ;;  %v371_v31 = vld [vmem:[#allocation5 + $0x200] sm:$0xff]  ;;  %v565_v60 = vld [vmem:[#allocation5 + $0x310] sm:$0xff] }
  0x29   :  { %1144 = vmatpush3.msra.mxu1 %v240_v12  ;;  %v370_v32 = vld [vmem:[#allocation5 + $0x1c8] sm:$0xff]  ;;  %v369_v33 = vld [vmem:[#allocation5 + $0x1c0] sm:$0xff]  ;;  %v564_v62 = vld [vmem:[#allocation5 + $0x2d8] sm:$0xff] }
  0x2a   :  { %1145 = vmatprep.subr.mxu1 %v239_v13  ;;  %v368_v34 = vld [vmem:[#allocation5 + $0x188] sm:$0xff]  ;;  %v367_v35 = vld [vmem:[#allocation5 + $0x180] sm:$0xff]  ;;  %v563_v63 = vld [vmem:[#allocation5 + $0x2d0] sm:$0xff] }
  0x2b   :  { %1146 = vmatpush3.msra.mxu1 %v239_v13  ;;  %v366_v36 = vld [vmem:[#allocation5 + $0x148] sm:$0xff]  ;;  %v365_v37 = vld [vmem:[#allocation5 + $0x140] sm:$0xff]  ;;  %v562_v0 = vld [vmem:[#allocation5 + $0x298] sm:$0xff] }
  0x2c   :  { %1147 = vmatprep.subr.mxu1 %v238_v14  ;;  %v364_v38 = vld [vmem:[#allocation5 + $0x108] sm:$0xff]  ;;  %v363_v39 = vld [vmem:[#allocation5 + $0x100] sm:$0xff]  ;;  %v561_v1 = vld [vmem:[#allocation5 + $0x290] sm:$0xff] }
  0x2d   :  { %1148 = vmatpush3.msra.mxu1 %v238_v14  ;;  %v362_v40 = vld [vmem:[#allocation5 + $0xc8] sm:$0xff]  ;;  %v361_v41 = vld [vmem:[#allocation5 + $0xc0] sm:$0xff]  ;;  %v560_v2 = vld [vmem:[#allocation5 + $0x258] sm:$0xff] }
  0x2e   :  { %573 = vmatprep.subr.mxu1 %v572_v16  ;;  %v1097_v42 = vld [vmem:[%s1372_s2] ss:$0 sm:$0xff]  ;;  %v559_v3 = vld [vmem:[#allocation5 + $0x250] sm:$0xff]  ;;  %v558_v4 = vld [vmem:[#allocation5 + $0x218] sm:$0xff] }
  0x2f   :  { %v557_v5 = vld [vmem:[#allocation5 + $0x210] sm:$0xff]  ;;  %v556_v6 = vld [vmem:[#allocation5 + $0x1d8] sm:$0xff]  ;;  %v360_v16 = vld [vmem:[#allocation5 + $0x88] sm:$0xff] }
  0x30   :  { %v551_v11 = vld [vmem:[#allocation5 + $0x150] sm:$0xff]  ;;  %v550_v12 = vld [vmem:[#allocation5 + $0x118] sm:$0xff] }
  0x31   :  { %v549_v13 = vld [vmem:[#allocation5 + $0x110] sm:$0xff]  ;;  %v548_v14 = vld [vmem:[#allocation5 + $0xd8] sm:$0xff] }
  0x32   :  { %v547_v15 = vld [vmem:[#allocation5 + $0xd0] sm:$0xff] }
  0x9a   :  { %v76_v7 = vpop.trf.xlu0 }
  0x9b   :  { %1127 = vmatprep.mubr.msk.f32.mxu0 %vm132_vm1, %v76_v7  ;;  %v555_v7 = vld [vmem:[#allocation5 + $0x1d0] sm:$0xff] }
  0x9e   :  { %v77_v8 = vpop.trf.xlu0 }
  0x9f   :  { %1128 = vmatmul.mubr.msk.f32.vlgmr.msra.gmra.mxu0 %vm132_vm1, %v77_v8  ;;  %v554_v8 = vld [vmem:[#allocation5 + $0x198] sm:$0xff] }
  0xa0   :  { %388 = vmatpush1.msra.mxu0 %v385_v17  ;;  %v546_v17 = vld [vmem:[#allocation5 + $0x98] sm:$0xff] }
  0xa1   :  { %389 = vmatprep.subr.mxu0 %v384_v18  ;;  %v359_v18 = vld [vmem:[#allocation5 + $0x80] sm:$0xff] }
  0xa2   :  { %v108_v9 = vpop.trf.xlu0  ;;  %390 = vmatpush1.msra.mxu0 %v383_v19  ;;  %v545_v19 = vld [vmem:[#allocation5 + $0x90] sm:$0xff] }
  0xa3   :  { %1130 = vmatprep.mubr.msk.f32.mxu0 %vm132_vm1, %v108_v9  ;;  %391 = vmatprep.subr.mxu0 %v382_v20  ;;  %v553_v9 = vld [vmem:[#allocation5 + $0x190] sm:$0xff]  ;;  %v358_v20 = vld [vmem:[#allocation5 + $0x48] sm:$0xff] }
  0xa4   :  { %392 = vmatpush1.msra.mxu0 %v381_v21  ;;  %v544_v21 = vld [vmem:[#allocation5 + $0x58] sm:$0xff] }
  0xa5   :  { %393 = vmatprep.subr.mxu0 %v380_v22  ;;  %v357_v22 = vld [vmem:[#allocation5 + $0x40] sm:$0xff] }
  0xa6   :  { %v109_v10 = vpop.trf.xlu0  ;;  %394 = vmatpush1.msra.mxu0 %v379_v23  ;;  %v543_v23 = vld [vmem:[#allocation5 + $0x50] sm:$0xff] }
  0xa7   :  { %1131 = vmatmul.mubr.msk.f32.gmra.mxu0 %vm132_vm1, %v109_v10  ;;  %395 = vmatprep.subr.mxu0 %v378_v24  ;;  %v552_v10 = vld [vmem:[#allocation5 + $0x158] sm:$0xff]  ;;  %v356_v24 = vld [vmem:[#allocation5 + $0x8] sm:$0xff] }
  0xa8   :  { %396 = vmatpush1.msra.mxu0 %v377_v25  ;;  %v542_v25 = vld [vmem:[#allocation5 + $0x18] sm:$0xff] }
  0xa9   :  { %397 = vmatprep.subr.mxu0 %v376_v26  ;;  %v355_v26 = vld [vmem:[#allocation5] sm:$0xff] }
  0xaa   :  { %398 = vmatpush1.msra.mxu0 %v375_v27  ;;  %v541_v27 = vld [vmem:[#allocation5 + $0x10] sm:$0xff] }
  0xab   :  { %399 = vmatprep.subr.mxu0 %v374_v28  ;;  %v752_v28 = vld [vmem:[#allocation5 + $0x3e8] sm:$0xff] }
  0xac   :  { %400 = vmatpush1.msra.mxu0 %v373_v29  ;;  %v932_v29 = vld [vmem:[#allocation5 + $0x3f8] sm:$0xff] }
  0xad   :  { %401 = vmatprep.subr.mxu0 %v372_v30  ;;  %v1237_v30 = vmov 0.0  }
  0xae   :  { %402 = vmatpush1.msra.mxu0 %v371_v31  ;;  %451 = vmatprep.mubr.f32.mxu0 %v1237_v30 }
  0xaf   :  { %403 = vmatprep.subr.mxu0 %v370_v32  ;;  %v1103_v32 = vld [vmem:[%s1374_s4] ss:$0 sm:$0xff]  ;;  %s1240_s4 = smov [#allocation7]  }
  0xb0   :  { %404 = vmatpush1.msra.mxu0 %v369_v33  ;;  %s1087_s16 = sshll.u32 %s1240_s4, 4  ;;  %s1088_s16 = int_to_ptr.vmem [resolvable:$true] %s1087_s16 }
  0xb1   :  { %405 = vmatprep.subr.mxu0 %v368_v34  ;;  %s1205_s17 = scalar_lea.vmem %s1088_s16, 256  ;;  %p1210_p11 = scmp.lt.s32.totalorder %s1088_s16, %s1088_s16 }
  0xb2   :  { %406 = vmatpush1.msra.mxu0 %v367_v35  ;;  %p1206_p10 = scmp.ne.s32.totalorder %s1088_s16, %s1205_s17  ;;  %p1211_p12 = scmp.lt.s32.totalorder %s1205_s17, %s1205_s17 }
  0xb3   :  { %407 = vmatprep.subr.mxu0 %v366_v36  ;;  %v751_v36 = vld [vmem:[#allocation5 + $0x3e0] sm:$0xff] }
  0xb4   :  { %408 = vmatpush1.msra.mxu0 %v365_v37  ;;  %v931_v37 = vld [vmem:[#allocation5 + $0x3f0] sm:$0xff]  ;;  %p1212_p13 = por %p1211_p12, %p1210_p11 }
  0xb5   :  { %409 = vmatprep.subr.mxu0 %v364_v38  ;;  %v750_v38 = vld [vmem:[#allocation5 + $0x3a8] sm:$0xff] }
  0xb6   :  { %410 = vmatpush1.msra.mxu0 %v363_v39  ;;  %v930_v39 = vld [vmem:[#allocation5 + $0x3b8] sm:$0xff]  ;;  %p1213_p0 = pnand %p1212_p13, %p1206_p10 }
  0xb7   :  { %411 = vmatprep.subr.mxu0 %v362_v40 }
  0xb8   :  { %412 = vmatpush1.msra.mxu0 %v361_v41  ;;  %v749_v41 = vld [vmem:[#allocation5 + $0x3a0] sm:$0xff] }
  0xb9   :  { %413 = vmatprep.subr.mxu0 %v360_v16  ;;  %v733_v16 = vld [vmem:[#allocation5 + $0x1a0] sm:$0xff] }
  0xba   :  { %414 = vmatpush1.msra.mxu0 %v359_v18  ;;  %v732_v18 = vld [vmem:[#allocation5 + $0x168] sm:$0xff] }
  0xbb   :  { %415 = vmatprep.subr.mxu0 %v358_v20  ;;  %v731_v20 = vld [vmem:[#allocation5 + $0x160] sm:$0xff] }
  0xbc   :  { %416 = vmatpush1.msra.mxu0 %v357_v22  ;;  %v730_v22 = vld [vmem:[#allocation5 + $0x128] sm:$0xff] }
  0xbd   :  { %417 = vmatprep.subr.mxu0 %v356_v24  ;;  %v729_v24 = vld [vmem:[#allocation5 + $0x120] sm:$0xff] }
  0xbe   :  { %418 = vmatpush1.msra.mxu0 %v355_v26  ;;  %v728_v26 = vld [vmem:[#allocation5 + $0xe8] sm:$0xff] }
  0xbf   :  { %753 = vmatprep.subr.mxu0 %v752_v28  ;;  %v727_v28 = vld [vmem:[#allocation5 + $0xe0] sm:$0xff] }
 0x15f   :  { %v1129_v43 = vpop.f32.mrf.mxu0 }
 0x160   :  { %v221_v44 = vadd.f32 %v1129_v43, %v1097_v42 }
 0x161   :  { %v215_v45 = vpop.f32.mrf.mxu0 }
 0x162   :  { %v216_v46 = vadd.f32 %v1097_v42, %v215_v45  ;;  %v235_v48 = vmax.f32 %v221_v44, 0.0  ;;  %v748_v44 = vld [vmem:[#allocation5 + $0x368] sm:$0xff]  ;;  %v928_v45 = vld [vmem:[#allocation5 + $0x378] sm:$0xff] }
 0x164   :  { %v234_v47 = vmax.f32 %v216_v46, 0.0 }
 0x166   :  { %1149 = vmatprep.mubr.msk.f32.mxu1 %vm253_vm2, %v234_v47 }
 0x167   :  { %v1132_v51 = vpop.f32.mrf.mxu0  ;;  %1150 = vmatmul.mubr.msk.f32.vlgmr.msra.gmra.mxu1 %vm253_vm2, %v235_v48 }
 0x168   :  { %v231_v53 = vadd.f32 %v1132_v51, %v1097_v42  ;;  %574 = vmatpush1.msra.mxu1 %v571_v49  ;;  %v747_v49 = vld [vmem:[#allocation5 + $0x360] sm:$0xff]  ;;  %v746_v51 = vld [vmem:[#allocation5 + $0x328] sm:$0xff] }
 0x169   :  { %v225_v55 = vpop.f32.mrf.mxu0  ;;  %575 = vmatprep.subr.mxu1 %v570_v50  ;;  %v927_v50 = vld [vmem:[#allocation5 + $0x370] sm:$0xff] }
 0x16a   :  { %v226_v57 = vadd.f32 %v1097_v42, %v225_v55  ;;  %576 = vmatpush1.msra.mxu1 %v569_v52  ;;  %v237_v59 = vmax.f32 %v231_v53, 0.0  ;;  %v929_v42 = vld [vmem:[#allocation5 + $0x3b0] sm:$0xff]  ;;  %v926_v52 = vld [vmem:[#allocation5 + $0x338] sm:$0xff]  ;;  %v745_v53 = vld [vmem:[#allocation5 + $0x320] sm:$0xff] }
 0x16b   :  { %577 = vmatprep.subr.mxu1 %v568_v54  ;;  %v925_v54 = vld [vmem:[#allocation5 + $0x330] sm:$0xff] }
 0x16c   :  { %v236_v61 = vmax.f32 %v226_v57, 0.0  ;;  %578 = vmatpush1.msra.mxu1 %v567_v56  ;;  %v744_v56 = vld [vmem:[#allocation5 + $0x2e8] sm:$0xff]  ;;  %v924_v57 = vld [vmem:[#allocation5 + $0x2f8] sm:$0xff] }
 0x16d   :  { %579 = vmatprep.subr.mxu1 %v566_v58 }
 0x16e   :  { %1152 = vmatprep.mubr.msk.f32.mxu1 %vm253_vm2, %v236_v61  ;;  %580 = vmatpush1.msra.mxu1 %v565_v60  ;;  %v923_v60 = vld [vmem:[#allocation5 + $0x2f0] sm:$0xff]  ;;  %v742_v61 = vld [vmem:[#allocation5 + $0x2a8] sm:$0xff] }
 0x16f   :  { %1153 = vmatmul.mubr.msk.f32.gmra.mxu1 %vm253_vm2, %v237_v59  ;;  %581 = vmatprep.subr.mxu1 %v564_v62  ;;  %v743_v59 = vld [vmem:[#allocation5 + $0x2e0] sm:$0xff]  ;;  %v922_v62 = vld [vmem:[#allocation5 + $0x2b8] sm:$0xff] }
 0x170   :  { %582 = vmatpush1.msra.mxu1 %v563_v63  ;;  %637 = vmatprep.mubr.f32.mxu1 %v1237_v30  ;;  %v741_v63 = vld [vmem:[#allocation5 + $0x2a0] sm:$0xff] }
 0x171   :  { %583 = vmatprep.subr.mxu1 %v562_v0  ;;  %v921_v0 = vld [vmem:[#allocation5 + $0x2b0] sm:$0xff] }
 0x172   :  { %584 = vmatpush1.msra.mxu1 %v561_v1 }
 0x173   :  { %585 = vmatprep.subr.mxu1 %v560_v2  ;;  %v740_v2 = vld [vmem:[#allocation5 + $0x268] sm:$0xff] }
 0x174   :  { %586 = vmatpush1.msra.mxu1 %v559_v3  ;;  %v920_v3 = vld [vmem:[#allocation5 + $0x278] sm:$0xff] }
 0x175   :  { %587 = vmatprep.subr.mxu1 %v558_v4  ;;  %v739_v4 = vld [vmem:[#allocation5 + $0x260] sm:$0xff] }
 0x176   :  { %588 = vmatpush1.msra.mxu1 %v557_v5  ;;  %v919_v5 = vld [vmem:[#allocation5 + $0x270] sm:$0xff] }
 0x177   :  { %589 = vmatprep.subr.mxu1 %v556_v6  ;;  %v738_v6 = vld [vmem:[#allocation5 + $0x228] sm:$0xff] }
 0x178   :  { %590 = vmatpush1.msra.mxu1 %v555_v7  ;;  %v918_v7 = vld [vmem:[#allocation5 + $0x238] sm:$0xff] }
 0x179   :  { %591 = vmatprep.subr.mxu1 %v554_v8  ;;  %v737_v8 = vld [vmem:[#allocation5 + $0x220] sm:$0xff] }
 0x17a   :  { %592 = vmatpush1.msra.mxu1 %v553_v9  ;;  %v917_v9 = vld [vmem:[#allocation5 + $0x230] sm:$0xff] }
 0x17b   :  { %593 = vmatprep.subr.mxu1 %v552_v10  ;;  %v736_v10 = vld [vmem:[#allocation5 + $0x1e8] sm:$0xff] }
 0x17c   :  { %594 = vmatpush1.msra.mxu1 %v551_v11  ;;  %v916_v11 = vld [vmem:[#allocation5 + $0x1f8] sm:$0xff] }
 0x17d   :  { %595 = vmatprep.subr.mxu1 %v550_v12  ;;  %v735_v12 = vld [vmem:[#allocation5 + $0x1e0] sm:$0xff] }
 0x17e   :  { %596 = vmatpush1.msra.mxu1 %v549_v13  ;;  %v915_v13 = vld [vmem:[#allocation5 + $0x1f0] sm:$0xff] }
 0x17f   :  { %597 = vmatprep.subr.mxu1 %v548_v14  ;;  %v734_v14 = vld [vmem:[#allocation5 + $0x1a8] sm:$0xff] }
 0x180   :  { %598 = vmatpush1.msra.mxu1 %v547_v15  ;;  %v914_v15 = vld [vmem:[#allocation5 + $0x1b8] sm:$0xff] }
 0x181   :  { %599 = vmatprep.subr.mxu1 %v546_v17  ;;  %v913_v17 = vld [vmem:[#allocation5 + $0x1b0] sm:$0xff] }
 0x182   :  { %600 = vmatpush1.msra.mxu1 %v545_v19  ;;  %v912_v19 = vld [vmem:[#allocation5 + $0x178] sm:$0xff] }
 0x183   :  { %601 = vmatprep.subr.mxu1 %v544_v21  ;;  %v911_v21 = vld [vmem:[#allocation5 + $0x170] sm:$0xff] }
 0x184   :  { %602 = vmatpush1.msra.mxu1 %v543_v23  ;;  %v910_v23 = vld [vmem:[#allocation5 + $0x138] sm:$0xff] }
 0x185   :  { %603 = vmatprep.subr.mxu1 %v542_v25  ;;  %v909_v25 = vld [vmem:[#allocation5 + $0x130] sm:$0xff] }
 0x186   :  { %604 = vmatpush1.msra.mxu1 %v541_v27  ;;  %v908_v27 = vld [vmem:[#allocation5 + $0xf8] sm:$0xff] }
 0x187   :  { %933 = vmatprep.subr.mxu1 %v932_v29  ;;  %v907_v29 = vld [vmem:[#allocation5 + $0xf0] sm:$0xff] }
 0x227   :  { %v1151_v31 = vpop.f32.mrf.mxu1 }
 0x228   :  { %v338_v40 = vadd.f32 %v1151_v31, %v1103_v32  ;;  %v726_v31 = vld [vmem:[#allocation5 + $0xa8] sm:$0xff] }
 0x229   :  { %v332_v33 = vpop.f32.mrf.mxu1 }
 0x22a   :  { %v333_v34 = vadd.f32 %v1103_v32, %v332_v33  ;;  %v1307_v47 = vmax.f32 %v338_v40, 0.0  ;;  %v725_v33 = vld [vmem:[#allocation5 + $0xa0] sm:$0xff]  ;;  %v722_v40 = vld [vmem:[#allocation5 + $0x28] sm:$0xff] }
 0x22c   :  { %v1303_v35 = vmax.f32 %v333_v34, 0.0  ;;  %v905_v34 = vld [vmem:[#allocation5 + $0xb0] sm:$0xff] }
 0x22e   :  { %452 = vmatmul.mubr.f32.vlgmr.msra.gmra.mxu0 %v1303_v35  ;;  %638 = vmatmul.mubr.f32.vlgmr.msra.gmra.mxu1 %v1303_v35 }
 0x22f   :  { %754 = vmatpush1.msra.mxu0 %v751_v36  ;;  %934 = vmatpush1.msra.mxu1 %v931_v37  ;;  %v1154_v43 = vpop.f32.mrf.mxu1  ;;  %v724_v36 = vld [vmem:[#allocation5 + $0x68] sm:$0xff]  ;;  %v904_v37 = vld [vmem:[#allocation5 + $0x78] sm:$0xff] }
 0x230   :  { %755 = vmatprep.subr.mxu0 %v750_v38  ;;  %935 = vmatprep.subr.mxu1 %v930_v39  ;;  %v348_v58 = vadd.f32 %v1154_v43, %v1103_v32  ;;  %v723_v38 = vld [vmem:[#allocation5 + $0x60] sm:$0xff]  ;;  %v903_v39 = vld [vmem:[#allocation5 + $0x70] sm:$0xff] }
 0x231   :  { %756 = vmatpush1.msra.mxu0 %v749_v41  ;;  %936 = vmatpush1.msra.mxu1 %v929_v42  ;;  %v342_v46 = vpop.f32.mrf.mxu1  ;;  %v902_v41 = vld [vmem:[#allocation5 + $0x38] sm:$0xff]  ;;  %v721_v42 = vld [vmem:[#allocation5 + $0x20] sm:$0xff]  ;;  %v901_v43 = vld [vmem:[#allocation5 + $0x30] sm:$0xff] }
 0x232   :  { %v343_v48 = vadd.f32 %v1103_v32, %v342_v46  ;;  %457 = vmatprep.mubr.f32.mxu0 %v1237_v30  ;;  %643 = vmatprep.mubr.f32.mxu1 %v1237_v30  ;;  %v1319_v1 = vmax.f32 %v348_v58, 0.0  ;;  %v906_v32 = vld [vmem:[#allocation5 + $0xb8] sm:$0xff] }
 0x233   :  { %757 = vmatprep.subr.mxu0 %v748_v44  ;;  %937 = vmatprep.subr.mxu1 %v928_v45 }
 0x234   :  { %458 = vmatmul.mubr.f32.gmra.mxu0 %v1307_v47  ;;  %644 = vmatmul.mubr.f32.gmra.mxu1 %v1307_v47  ;;  %v1313_v55 = vmax.f32 %v343_v48, 0.0 }
 0x235   :  { %758 = vmatpush1.msra.mxu0 %v747_v49  ;;  %938 = vmatpush1.msra.mxu1 %v927_v50 }
 0x236   :  { %759 = vmatprep.subr.mxu0 %v746_v51  ;;  %939 = vmatprep.subr.mxu1 %v926_v52 }
 0x237   :  { %760 = vmatpush1.msra.mxu0 %v745_v53  ;;  %940 = vmatpush1.msra.mxu1 %v925_v54 }
 0x238   :  { %463 = vmatprep.mubr.f32.mxu0 %v1237_v30  ;;  %649 = vmatprep.mubr.f32.mxu1 %v1237_v30 }
 0x239   :  { %761 = vmatprep.subr.mxu0 %v744_v56  ;;  %941 = vmatprep.subr.mxu1 %v924_v57 }
 0x23a   :  { %464 = vmatmul.mubr.f32.gmra.mxu0 %v1313_v55  ;;  %650 = vmatmul.mubr.f32.gmra.mxu1 %v1313_v55 }
 0x23b   :  { %762 = vmatpush1.msra.mxu0 %v743_v59  ;;  %942 = vmatpush1.msra.mxu1 %v923_v60 }
 0x23c   :  { %763 = vmatprep.subr.mxu0 %v742_v61  ;;  %943 = vmatprep.subr.mxu1 %v922_v62 }
 0x23d   :  { %764 = vmatpush1.msra.mxu0 %v741_v63  ;;  %944 = vmatpush1.msra.mxu1 %v921_v0 }
 0x23e   :  { %469 = vmatprep.mubr.f32.mxu0 %v1237_v30  ;;  %655 = vmatprep.mubr.f32.mxu1 %v1237_v30 }
 0x23f   :  { %765 = vmatprep.subr.mxu0 %v740_v2  ;;  %945 = vmatprep.subr.mxu1 %v920_v3 }
 0x240   :  { %470 = vmatmul.mubr.f32.gmra.mxu0 %v1319_v1  ;;  %656 = vmatmul.mubr.f32.gmra.mxu1 %v1319_v1 }
 0x241   :  { %766 = vmatpush1.msra.mxu0 %v739_v4  ;;  %946 = vmatpush1.msra.mxu1 %v919_v5 }
 0x242   :  { %767 = vmatprep.subr.mxu0 %v738_v6  ;;  %947 = vmatprep.subr.mxu1 %v918_v7 }
 0x243   :  { %768 = vmatpush1.msra.mxu0 %v737_v8  ;;  %948 = vmatpush1.msra.mxu1 %v917_v9 }
 0x244   :  { %769 = vmatprep.subr.mxu0 %v736_v10  ;;  %949 = vmatprep.subr.mxu1 %v916_v11 }
 0x245   :  { %770 = vmatpush1.msra.mxu0 %v735_v12  ;;  %950 = vmatpush1.msra.mxu1 %v915_v13 }
 0x246   :  { %771 = vmatprep.subr.mxu0 %v734_v14  ;;  %951 = vmatprep.subr.mxu1 %v914_v15 }
 0x247   :  { %772 = vmatpush1.msra.mxu0 %v733_v16  ;;  %952 = vmatpush1.msra.mxu1 %v913_v17 }
 0x248   :  { %773 = vmatprep.subr.mxu0 %v732_v18  ;;  %953 = vmatprep.subr.mxu1 %v912_v19 }
 0x249   :  { %774 = vmatpush1.msra.mxu0 %v731_v20  ;;  %954 = vmatpush1.msra.mxu1 %v911_v21 }
 0x24a   :  { %775 = vmatprep.subr.mxu0 %v730_v22  ;;  %955 = vmatprep.subr.mxu1 %v910_v23 }
 0x24b   :  { %776 = vmatpush1.msra.mxu0 %v729_v24  ;;  %956 = vmatpush1.msra.mxu1 %v909_v25 }
 0x24c   :  { %777 = vmatprep.subr.mxu0 %v728_v26  ;;  %957 = vmatprep.subr.mxu1 %v908_v27  ;;  %v1239_v27 = vmov 1983009808  }
 0x24d   :  { %778 = vmatpush1.msra.mxu0 %v727_v28  ;;  %958 = vmatpush1.msra.mxu1 %v907_v29  ;;  %v511_v28 = vunpack.c.l.s4 %v1239_v27  ;;  %v513_v29 = vlaneseq }
 0x24e   :  { %779 = vmatprep.subr.mxu0 %v726_v31  ;;  %959 = vmatprep.subr.mxu1 %v906_v32 }
 0x24f   :  { %780 = vmatpush1.msra.mxu0 %v725_v33  ;;  %960 = vmatpush1.msra.mxu1 %v905_v34 }
 0x250   :  { %781 = vmatprep.subr.mxu0 %v724_v36  ;;  %961 = vmatprep.subr.mxu1 %v904_v37 }
 0x251   :  { %782 = vmatpush1.msra.mxu0 %v723_v38  ;;  %962 = vmatpush1.msra.mxu1 %v903_v39 }
 0x252   :  { %783 = vmatprep.subr.mxu0 %v722_v40  ;;  %963 = vmatprep.subr.mxu1 %v902_v41 }
 0x253   :  { %784 = vmatpush1.msra.mxu0 %v721_v42  ;;  %817 = vmatprep.mubr.f32.mxu0 %v1237_v30 }
 0x254   :  { %964 = vmatpush1.msra.mxu1 %v901_v43  ;;  %997 = vmatprep.mubr.f32.mxu1 %v1237_v30 }
 0x255   :  { %818 = vmatmul.mubr.f32.vlgmr.msra.gmra.mxu0 %v1303_v35  ;;  %998 = vmatmul.mubr.f32.vlgmr.msra.gmra.mxu1 %v1303_v35  ;;  %v1238_v35 = vmov -inf  }
 0x256   :  { %823 = vmatprep.mubr.f32.mxu0 %v1237_v30  ;;  %1003 = vmatprep.mubr.f32.mxu1 %v1237_v30  ;;  %56 = vst [vmem:[#allocation7] sm:$0xff] %v1238_v35  ;;  %57 = vst [vmem:[#allocation7 + $0x8] sm:$0xff] %v1238_v35  ;;  %v512_v35 = vunpack.c.0.s8 %v511_v28 }
 0x259   :  { %824 = vmatmul.mubr.f32.gmra.mxu0 %v1307_v47  ;;  %1004 = vmatmul.mubr.f32.gmra.mxu1 %v1307_v47 }
 0x25a   :  { %829 = vmatprep.mubr.f32.mxu0 %v1237_v30  ;;  %1009 = vmatprep.mubr.f32.mxu1 %v1237_v30 }
 0x25d   :  { %830 = vmatmul.mubr.f32.gmra.mxu0 %v1313_v55  ;;  %1010 = vmatmul.mubr.f32.gmra.mxu1 %v1313_v55 }
 0x25e   :  { %835 = vmatprep.mubr.f32.mxu0 %v1237_v30  ;;  %1015 = vmatprep.mubr.f32.mxu1 %v1237_v30 }
 0x261   :  { %836 = vmatmul.mubr.f32.gmra.mxu0 %v1319_v1  ;;  %1016 = vmatmul.mubr.f32.gmra.mxu1 %v1319_v1 }
 0x2ee   :  { %v453_v44 = vpop.f32.mrf.mxu0  ;;  %v639_v45 = vpop.f32.mrf.mxu1 }
 0x2f0   :  { %v455_v46 = vpop.f32.mrf.mxu0  ;;  %v641_v47 = vpop.f32.mrf.mxu1 }
 0x2f4   :  { %v459_v48 = vpop.f32.mrf.mxu0  ;;  %v645_v49 = vpop.f32.mrf.mxu1 }
 0x2f5   :  { %v477_v50 = vmax.f32 %v453_v44, %v459_v48  ;;  %v663_v51 = vmax.f32 %v639_v45, %v645_v49  ;;  %v514_v44 = vshrl.u32 %v513_v29, 7 }
 0x2f6   :  { %v461_v52 = vpop.f32.mrf.mxu0  ;;  %v647_v53 = vpop.f32.mrf.mxu1 }
 0x2f7   :  { %v484_v54 = vmax.f32 %v455_v46, %v461_v52  ;;  %v670_v55 = vmax.f32 %v641_v47, %v647_v53  ;;  %v478_v57 = vrot.slane %v477_v50, 4  ;;  %v664_v58 = vrot.slane %v663_v51, 4 }
 0x2f9   :  { %v485_v30 = vrot.slane %v484_v54, 4  ;;  %v671_v56 = vrot.slane %v670_v55, 4  ;;  %v479_v1 = vmax.f32 %v477_v50, %v478_v57  ;;  %v665_v2 = vmax.f32 %v663_v51, %v664_v58 }
 0x2fa   :  { %v465_v59 = vpop.f32.mrf.mxu0  ;;  %v651_v60 = vpop.f32.mrf.mxu1 }
 0x2fb   :  { %v486_v63 = vmax.f32 %v484_v54, %v485_v30  ;;  %v672_v0 = vmax.f32 %v670_v55, %v671_v56  ;;  %v480_v7 = vrot.slane %v479_v1, 2  ;;  %v666_v8 = vrot.slane %v665_v2, 2 }
 0x2fc   :  { %v467_v61 = vpop.f32.mrf.mxu0  ;;  %v653_v62 = vpop.f32.mrf.mxu1  ;;  %v1341_v56 = vsub.s32 %v512_v35, %v514_v44 }
 0x2fd   :  { %v487_v5 = vrot.slane %v486_v63, 2  ;;  %v673_v6 = vrot.slane %v672_v0, 2  ;;  %v481_v21 = vmax.f32 %v479_v1, %v480_v7  ;;  %v667_v22 = vmax.f32 %v665_v2, %v666_v8 }
 0x2ff   :  { %v488_v17 = vmax.f32 %v486_v63, %v487_v5  ;;  %v674_v18 = vmax.f32 %v672_v0, %v673_v6  ;;  %v482_v38 = vrot.slane %v481_v21, 1  ;;  %v668_v39 = vrot.slane %v667_v22, 1 }
 0x300   :  { %v471_v3 = vpop.f32.mrf.mxu0  ;;  %v657_v4 = vpop.f32.mrf.mxu1 }
 0x301   :  { %v491_v9 = vmax.f32 %v465_v59, %v471_v3  ;;  %v677_v10 = vmax.f32 %v651_v60, %v657_v4  ;;  %v489_v33 = vrot.slane %v488_v17, 1  ;;  %v675_v34 = vrot.slane %v674_v18, 1 }
 0x302   :  { %v473_v11 = vpop.f32.mrf.mxu0  ;;  %v659_v12 = vpop.f32.mrf.mxu1  ;;  %v483_v51 = vmax.f32 %v481_v21, %v482_v38  ;;  %v669_v52 = vmax.f32 %v667_v22, %v668_v39 }
 0x303   :  { %v498_v13 = vmax.f32 %v467_v61, %v473_v11  ;;  %v684_v14 = vmax.f32 %v653_v62, %v659_v12  ;;  %v492_v15 = vrot.slane %v491_v9, 4  ;;  %v678_v16 = vrot.slane %v677_v10, 4  ;;  %v662_v11 = vld [vmem:[#allocation7 + $0x4] sm:$0xf] }
 0x304   :  { %v490_v47 = vmax.f32 %v488_v17, %v489_v33  ;;  %v676_v48 = vmax.f32 %v674_v18, %v675_v34 }
 0x305   :  { %v499_v19 = vrot.slane %v498_v13, 4  ;;  %v685_v20 = vrot.slane %v684_v14, 4  ;;  %v493_v23 = vmax.f32 %v491_v9, %v492_v15  ;;  %v679_v24 = vmax.f32 %v677_v10, %v678_v16  ;;  %v476_v9 = vld [vmem:[#allocation7] sm:$0xf] }
 0x306   :  { %v509_v57 = vcombine.low %v483_v51, %v490_v47  ;;  %v695_v58 = vcombine.low %v669_v52, %v676_v48 }
 0x307   :  { %v500_v25 = vmax.f32 %v498_v13, %v499_v19  ;;  %v686_v26 = vmax.f32 %v684_v14, %v685_v20  ;;  %v494_v31 = vrot.slane %v493_v23, 2  ;;  %v680_v32 = vrot.slane %v679_v24, 2 }
 0x308   :  { %v516_v63 = vrot.slane %v509_v57, %v1341_v56  ;;  %v702_v0 = vrot.slane %v695_v58, %v1341_v56 }
 0x309   :  { %v501_v36 = vrot.slane %v500_v25, 2  ;;  %v687_v37 = vrot.slane %v686_v26, 2  ;;  %v495_v40 = vmax.f32 %v493_v23, %v494_v31  ;;  %v681_v41 = vmax.f32 %v679_v24, %v680_v32 }
 0x30b   :  { %v502_v42 = vmax.f32 %v500_v25, %v501_v36  ;;  %v688_v43 = vmax.f32 %v686_v26, %v687_v37  ;;  %v496_v45 = vrot.slane %v495_v40, 1  ;;  %v682_v46 = vrot.slane %v681_v41, 1 }
 0x30d   :  { %v503_v49 = vrot.slane %v502_v42, 1  ;;  %v689_v50 = vrot.slane %v688_v43, 1  ;;  %v497_v53 = vmax.f32 %v495_v40, %v496_v45  ;;  %v683_v54 = vmax.f32 %v681_v41, %v682_v46 }
 0x30f   :  { %v504_v55 = vmax.f32 %v502_v42, %v503_v49  ;;  %v690_v30 = vmax.f32 %v688_v43, %v689_v50 }
 0x311   :  { %v517_v59 = vcombine.low %v497_v53, %v504_v55  ;;  %v703_v60 = vcombine.low %v683_v54, %v690_v30 }
 0x313   :  { %v524_v61 = vrot.slane %v517_v59, %v1341_v56  ;;  %v710_v62 = vrot.slane %v703_v60, %v1341_v56 }
 0x315   :  { %v529_v1 = vrot.slane %v524_v61, 7  ;;  %v713_v2 = vrot.slane %v710_v62, 7  ;;  %v819_v3 = vpop.f32.mrf.mxu0  ;;  %v999_v4 = vpop.f32.mrf.mxu1 }
 0x317   :  { %v531_v5 = vsel %vm530_vm3, %v529_v1, %v516_v63  ;;  %v714_v6 = vsel %vm530_vm3, %v713_v2, %v702_v0  ;;  %v821_v7 = vpop.f32.mrf.mxu0  ;;  %v1001_v8 = vpop.f32.mrf.mxu1 }
 0x318   :  { %v533_v10 = vsel %vm532_vm4, %v529_v1, %v531_v5  ;;  %v715_v12 = vsel %vm532_vm4, %v713_v2, %v714_v6 }
 0x319   :  { %v825_v13 = vpop.f32.mrf.mxu0  ;;  %v1005_v14 = vpop.f32.mrf.mxu1  ;;  %v535_v15 = vsel %vm534_vm5, %v529_v1, %v533_v10  ;;  %v716_v16 = vsel %vm534_vm5, %v713_v2, %v715_v12 }
 0x31a   :  { %v843_v17 = vmax.f32 %v819_v3, %v825_v13  ;;  %v1023_v18 = vmax.f32 %v999_v4, %v1005_v14  ;;  %v537_v19 = vsel %vm536_vm6, %v529_v1, %v535_v15  ;;  %v717_v20 = vsel %vm536_vm6, %v713_v2, %v716_v16 }
 0x31b   :  { %v827_v21 = vpop.f32.mrf.mxu0  ;;  %v1007_v22 = vpop.f32.mrf.mxu1  ;;  %v539_v23 = vmax.f32 %v476_v9, %v537_v19  ;;  %v719_v24 = vmax.f32 %v662_v11, %v717_v20 }
 0x31c   :  { %v844_v25 = vrot.slane %v843_v17, 4  ;;  %v1024_v26 = vrot.slane %v1023_v18, 4  ;;  %v850_v27 = vmax.f32 %v821_v7, %v827_v21  ;;  %v1030_v28 = vmax.f32 %v1001_v8, %v1007_v22 }
 0x31d   :  { %v831_v29 = vpop.f32.mrf.mxu0  ;;  %v1011_v31 = vpop.f32.mrf.mxu1  ;;  %540 = vst [vmem:[#allocation7] sm:$0xf] %v539_v23  ;;  %720 = vst [vmem:[#allocation7 + $0x4] sm:$0xf] %v719_v24 }
 0x31e   :  { %v851_v32 = vrot.slane %v850_v27, 4  ;;  %v1031_v33 = vrot.slane %v1030_v28, 4  ;;  %v845_v37 = vmax.f32 %v843_v17, %v844_v25  ;;  %v1025_v38 = vmax.f32 %v1023_v18, %v1024_v26 }
 0x31f   :  { %v833_v34 = vpop.f32.mrf.mxu0  ;;  %v1013_v36 = vpop.f32.mrf.mxu1 }
 0x320   :  { %v852_v39 = vmax.f32 %v850_v27, %v851_v32  ;;  %v1032_v40 = vmax.f32 %v1030_v28, %v1031_v33  ;;  %v846_v48 = vrot.slane %v845_v37, 2  ;;  %v1026_v49 = vrot.slane %v1025_v38, 2 }
 0x321   :  { %v837_v41 = vpop.f32.mrf.mxu0  ;;  %v1017_v42 = vpop.f32.mrf.mxu1 }
 0x322   :  { %v853_v43 = vrot.slane %v852_v39, 2  ;;  %v1033_v35 = vrot.slane %v1032_v40, 2  ;;  %v857_v44 = vmax.f32 %v831_v29, %v837_v41  ;;  %v1037_v45 = vmax.f32 %v1011_v31, %v1017_v42 }
 0x323   :  { %v839_v46 = vpop.f32.mrf.mxu0  ;;  %v1019_v47 = vpop.f32.mrf.mxu1  ;;  %v847_v60 = vmax.f32 %v845_v37, %v846_v48  ;;  %v1027_v61 = vmax.f32 %v1025_v38, %v1026_v49  ;;  %v842_v38 = vld [vmem:[#allocation7 + $0x8] sm:$0xf] }
 0x324   :  { %v858_v50 = vrot.slane %v857_v44, 4  ;;  %v1038_v51 = vrot.slane %v1037_v45, 4  ;;  %v864_v52 = vmax.f32 %v833_v34, %v839_v46  ;;  %v1044_v53 = vmax.f32 %v1013_v36, %v1019_v47 }
 0x325   :  { %v854_v54 = vmax.f32 %v852_v39, %v853_v43  ;;  %v1034_v55 = vmax.f32 %v1032_v40, %v1033_v35  ;;  %v848_v8 = vrot.slane %v847_v60, 1  ;;  %v1028_v9 = vrot.slane %v1027_v61, 1  ;;  %v1022_v40 = vld [vmem:[#allocation7 + $0xc] sm:$0xf] }
 0x326   :  { %v859_v30 = vmax.f32 %v857_v44, %v858_v50  ;;  %v1039_v57 = vmax.f32 %v1037_v45, %v1038_v51  ;;  %v865_v58 = vrot.slane %v864_v52, 4  ;;  %v1045_v59 = vrot.slane %v1044_v53, 4 }
 0x327   :  { %v855_v2 = vrot.slane %v854_v54, 1  ;;  %v1035_v3 = vrot.slane %v1034_v55, 1  ;;  %v849_v18 = vmax.f32 %v847_v60, %v848_v8  ;;  %v1029_v19 = vmax.f32 %v1027_v61, %v1028_v9 }
 0x328   :  { %v860_v62 = vrot.slane %v859_v30, 2  ;;  %v1040_v63 = vrot.slane %v1039_v57, 2  ;;  %v866_v0 = vmax.f32 %v864_v52, %v865_v58  ;;  %v1046_v1 = vmax.f32 %v1044_v53, %v1045_v59 }
 0x329   :  { %v856_v14 = vmax.f32 %v854_v54, %v855_v2  ;;  %v1036_v15 = vmax.f32 %v1034_v55, %v1035_v3 }
 0x32a   :  { %v861_v4 = vmax.f32 %v859_v30, %v860_v62  ;;  %v1041_v5 = vmax.f32 %v1039_v57, %v1040_v63  ;;  %v867_v6 = vrot.slane %v866_v0, 2  ;;  %v1047_v7 = vrot.slane %v1046_v1, 2 }
 0x32b   :  { %v875_v24 = vcombine.low %v849_v18, %v856_v14  ;;  %v1055_v25 = vcombine.low %v1029_v19, %v1036_v15 }
 0x32c   :  { %v862_v10 = vrot.slane %v861_v4, 1  ;;  %v1042_v11 = vrot.slane %v1041_v5, 1  ;;  %v868_v12 = vmax.f32 %v866_v0, %v867_v6  ;;  %v1048_v13 = vmax.f32 %v1046_v1, %v1047_v7 }
 0x32d   :  { %v882_v31 = vrot.slane %v875_v24, %v1341_v56  ;;  %v1062_v32 = vrot.slane %v1055_v25, %v1341_v56 }
 0x32e   :  { %v869_v16 = vrot.slane %v868_v12, 1  ;;  %v1049_v17 = vrot.slane %v1048_v13, 1  ;;  %v863_v20 = vmax.f32 %v861_v4, %v862_v10  ;;  %v1043_v21 = vmax.f32 %v1041_v5, %v1042_v11 }
 0x330   :  { %v870_v22 = vmax.f32 %v868_v12, %v869_v16  ;;  %v1050_v23 = vmax.f32 %v1048_v13, %v1049_v17 }
 0x332   :  { %v883_v26 = vcombine.low %v863_v20, %v870_v22  ;;  %v1063_v27 = vcombine.low %v1043_v21, %v1050_v23 }
 0x334   :  { %v890_v28 = vrot.slane %v883_v26, %v1341_v56  ;;  %v1070_v29 = vrot.slane %v1063_v27, %v1341_v56 }
 0x336   :  { %v893_v33 = vrot.slane %v890_v28, 7  ;;  %v1073_v34 = vrot.slane %v1070_v29, 7 }
 0x338   :  { %v894_v36 = vsel %vm530_vm3, %v893_v33, %v882_v31  ;;  %v1074_v37 = vsel %vm530_vm3, %v1073_v34, %v1062_v32 }
 0x339   :  { %v895_v39 = vsel %vm532_vm4, %v893_v33, %v894_v36  ;;  %v1075_v41 = vsel %vm532_vm4, %v1073_v34, %v1074_v37 }
 0x33a   :  { %v896_v42 = vsel %vm534_vm5, %v893_v33, %v895_v39  ;;  %v1076_v43 = vsel %vm534_vm5, %v1073_v34, %v1075_v41 }
 0x33b   :  { %v897_v56 = vsel %vm536_vm6, %v893_v33, %v896_v42  ;;  %v1077_v35 = vsel %vm536_vm6, %v1073_v34, %v1076_v43 }
 0x33c   :  { %v899_v44 = vmax.f32 %v842_v38, %v897_v56  ;;  %v1079_v45 = vmax.f32 %v1022_v40, %v1077_v35 }
 0x33e   :  { %900 = vst [vmem:[#allocation7 + $0x8] sm:$0xf] %v899_v44  ;;  %1080 = vst [vmem:[#allocation7 + $0xc] sm:$0xf] %v1079_v45 }
 0x33f   :  { %1216 = shalt.err (!%p1213_p0)
}
 0x340   :  { %1090 = dma.vmem_to_hbm [thread:$0]  %s1088_s16, 256, %s1376_s6, [#allocation4]  }
 0x341   :  { %1229 = dma.done.wait [#allocation4], 256  }
 0x342   :  { %1230 = vsyncadd [#allocation4], 4294967040 }
 0x343   :  { %1094 = vsyncpa [#allocation3], 1 }
 0x344   :  { %1095 = vsyncpa [#allocation6], 1 }
 0x345   :  { %1096 = vsyncpa [#allocation4], 1 }

</bundles_post_ra>
